<compile_context>
chip_gen: v6e
topology: v6e:2x2x1
jax: 0.10.0
libtpu: 0.0.40
codegen_flags: <defaults>
</compile_context>

<pallas_src>
import math
import numpy as np
import jax
import jax.numpy as jnp
from jax.experimental import pallas as pl
from jax.experimental.pallas import tpu as pltpu

_LANE = 128
_SUB = 8
_TARGET_BLOCK_BYTES = 4 << 20  # ~4 MiB per block (x4 live buffers < 32 MiB)
_MAX_TT = 4096                 # lane-tile width (multiple of 128)


def _contrast_kernel(c_ref, x_ref, o_ref):
    # c_ref: SMEM (1,) f32 scalar-prefetch = amount/750
    # x_ref/o_ref: (TR, TT) VMEM tiles in the array's native dtype.
    c = c_ref[0]
    t1 = x_ref[...].astype(jnp.float32) * (math.pi / 2.0)
    o_ref[...] = jnp.sin(t1 + c * jnp.sin(t1 * 4.0)).astype(o_ref.dtype)


def contrast_pallas(x, enhancement_amount):
    """torchaudio.functional.contrast(x, enhancement_amount) on TPU via Pallas.

    Works for any float dtype / any shape (pads to the (8,128) grain)."""
    orig_shape = x.shape
    orig_dtype = x.dtype
    n = int(np.prod(orig_shape))
    itemsize = jnp.dtype(orig_dtype).itemsize

    # Lane-dense tiling: wide last dim (multiple of 128), big row tile.
    tt = min(_MAX_TT, pl.cdiv(n, _LANE) * _LANE)
    rows = pl.cdiv(n, tt)
    target_rows = max(_SUB, ((_TARGET_BLOCK_BYTES // (tt * itemsize)) // _SUB) * _SUB)
    if rows <= target_rows:
        tr = rows                      # single block covers all rows (full extent)
        padded_rows = rows
    else:
        tr = target_rows               # multiple of 8
        padded_rows = pl.cdiv(rows, tr) * tr

    padded_n = padded_rows * tt
    x_flat = x.reshape(-1)
    if padded_n != n:
        # TODO(synk): padding/slicing is an extra HBM pass for ragged shapes;
        # aligned shapes (the common case) skip it entirely.
        x_flat = jnp.pad(x_flat, (0, padded_n - n))
    x2 = x_flat.reshape(padded_rows, tt)

    # Pre-fold amount/750 on the host; keep it a prefetch scalar (no recompile
    # across random amounts).
    contrast = jnp.asarray([enhancement_amount], dtype=jnp.float32) / 750.0

    out = pl.pallas_call(
        _contrast_kernel,
        out_shape=jax.ShapeDtypeStruct((padded_rows, tt), orig_dtype),
        grid_spec=pltpu.PrefetchScalarGridSpec(
            num_scalar_prefetch=1,
            grid=(padded_rows // tr,),
            in_specs=[pl.BlockSpec((tr, tt), lambda i, c: (i, 0))],
            out_specs=pl.BlockSpec((tr, tt), lambda i, c: (i, 0)),
        ),
        compiler_params=pltpu.CompilerParams(
            dimension_semantics=("parallel",)),
    )(contrast, x2)

    out_flat = out.reshape(-1)
    if padded_n != n:
        out_flat = out_flat[:n]
    return out_flat.reshape(orig_shape)


def rand_contrast_1d(x, lines=None, labels=None, *, chance=0.5,
                     enhancement=75.0, rng=None):
    """Mirror of RandContrast1D.forward.

    The original module computes contrast() and throws the result away, then
    returns x unchanged.  We preserve the RNG draws (same random stream) but do
    NOT launch the dead kernel — identical forward semantics, zero wasted HBM
    traffic / host stall.  Use `contrast_pallas` directly to actually apply the
    enhancement."""
    if rng is None:
        rng = np.random.default_rng(0)
    if enhancement < 0 or enhancement > 100:
        enhancement = abs(enhancement % 100)
    if rng.uniform() < chance:
        _amount = float(rng.uniform()) * enhancement  # drawn, result discarded upstream
        # Intentionally NOT calling contrast_pallas(x, _amount): output is dead.
    return (x, lines, labels)


if __name__ == "__main__":
    key = jax.random.PRNGKey(0)

    def _contrast_ref(x, amount):
        xf = x.astype(jnp.float32)
        t1 = xf * (math.pi / 2.0)
        return jnp.sin(t1 + (amount / 750.0) * jnp.sin(t1 * 4.0)).astype(x.dtype)

    # 1) Small aligned shape (single block).
    B, C, T = 2, 4, 128
    x = jax.random.uniform(key, (B, C, T), dtype=jnp.float32,
                           minval=-1.0, maxval=1.0)
    amount = 42.0
    y = jax.block_until_ready(contrast_pallas(x, amount))
    np.testing.assert_allclose(np.asarray(y), np.asarray(_contrast_ref(x, amount)),
                               rtol=1e-5, atol=1e-5)

    # 2) Ragged shape (exercises padding path).
    k2 = jax.random.fold_in(key, 1)
    xr = jax.random.uniform(k2, (2, 3, 100), dtype=jnp.float32,
                            minval=-1.0, maxval=1.0)
    yr = jax.block_until_ready(contrast_pallas(xr, 13.5))
    np.testing.assert_allclose(np.asarray(yr), np.asarray(_contrast_ref(xr, 13.5)),
                               rtol=1e-5, atol=1e-5)

    # 3) Larger aligned shape (exercises the multi-block tiled grid path).
    k3 = jax.random.fold_in(key, 2)
    xl = jax.random.uniform(k3, (2, 4, 262144), dtype=jnp.float32,
                            minval=-1.0, maxval=1.0)
    yl = jax.block_until_ready(contrast_pallas(xl, 75.0))
    np.testing.assert_allclose(np.asarray(yl), np.asarray(_contrast_ref(xl, 75.0)),
                               rtol=1e-5, atol=1e-5)

    # 4) bf16 I/O (native-dtype HBM boundary, f32 math inside the kernel).
    xb = x.astype(jnp.bfloat16)
    yb = jax.block_until_ready(contrast_pallas(xb, amount))
    np.testing.assert_allclose(np.asarray(yb, dtype=np.float32),
                               np.asarray(_contrast_ref(xb, amount), dtype=np.float32),
                               rtol=1e-2, atol=1e-2)

    # 5) Module-equivalent wrapper: x must come back unchanged (upstream bug kept).
    out_x, out_lines, out_labels = rand_contrast_1d(
        x, None, None, chance=1.0, enhancement=75.0,
        rng=np.random.default_rng(0))
    jax.block_until_ready(out_x)
    np.testing.assert_allclose(np.asarray(out_x), np.asarray(x))
    assert out_lines is None and out_labels is None

    print("KERNEL_OK")
</pallas_src>

<mosaic_0001>
module attributes {stable_mosaic.version = 11 : i64} {
  func.func @_contrast_kernel(%arg0: i32, %arg1: memref<1xf32, #tpu.memory_space<smem>>, %arg2: memref<1x1024xf32, #tpu.memory_space<vmem>>, %arg3: memref<1x1024xf32, #tpu.memory_space<vmem>>) attributes {dimension_semantics = [#tpu.dimension_semantics<parallel>], iteration_bounds = array<i64: 1>, scalar_prefetch = 1 : i64, scratch_operands = 0 : i64, tpu.core_type = #tpu.core_type<tc>, window_params = [{transform_indices = @transform_0, window_bounds = array<i64: 1, 1024>}, {transform_indices = @transform_1, window_bounds = array<i64: 1, 1024>}]} {
    %c0 = arith.constant 0 : index
    %0 = memref.load %arg1[%c0] : memref<1xf32, #tpu.memory_space<smem>>
    %c0_0 = arith.constant 0 : index
    %c0_1 = arith.constant 0 : index
    %1 = vector.load %arg2[%c0_0, %c0_1] : memref<1x1024xf32, #tpu.memory_space<vmem>>, vector<1x1024xf32>
    %cst = arith.constant 1.57079637 : f32
    %2 = vector.broadcast %cst : f32 to vector<1x1024xf32>
    %3 = arith.mulf %1, %2 : vector<1x1024xf32>
    %cst_2 = arith.constant 4.000000e+00 : f32
    %4 = vector.broadcast %cst_2 : f32 to vector<1x1024xf32>
    %5 = arith.mulf %3, %4 : vector<1x1024xf32>
    %6 = math.sin %5 : vector<1x1024xf32>
    %7 = vector.broadcast %0 : f32 to vector<1x1024xf32>
    %8 = arith.mulf %7, %6 : vector<1x1024xf32>
    %9 = arith.addf %3, %8 : vector<1x1024xf32>
    %10 = math.sin %9 : vector<1x1024xf32>
    %c0_3 = arith.constant 0 : index
    %c0_4 = arith.constant 0 : index
    %11 = vector.load %arg3[%c0_3, %c0_4] : memref<1x1024xf32, #tpu.memory_space<vmem>>, vector<1x1024xf32>
    tpu.vector_store %arg3[%c0_3, %c0_4], %10 {strides = array<i32>} : memref<1x1024xf32, #tpu.memory_space<vmem>>, vector<1x1024xf32>,
    return
  }
  func.func @transform_0(%arg0: i32, %arg1: memref<1xf32, #tpu.memory_space<smem>>) -> (i32, i32) {
    %c0_i32 = arith.constant 0 : i32
    %c0_i32_0 = arith.constant 0 : i32
    return %arg0, %c0_i32 : i32, i32
  }
  func.func @transform_1(%arg0: i32, %arg1: memref<1xf32, #tpu.memory_space<smem>>) -> (i32, i32) {
    %c0_i32 = arith.constant 0 : i32
    %c0_i32_0 = arith.constant 0 : i32
    return %arg0, %c0_i32 : i32, i32
  }
}

</mosaic_0001>

<bundles_post_ra>
// kernel: tpu_custom_call.1
= control target key start
LH: loop header
LB: loop body
LE: loop exit
PB: predicated region body
PF: predicated region fallthrough
CT: control target
= control target key end

     0   :  { %8 = vsyncpa [#allocation5], 0  ;;  %s430_s0 = inlined_call_operand.<no memory space> [shape: f32[1], index: 0, kind: input, shape index: {}]   ;;  %s431_s1 = inlined_call_operand.hbm [shape: f32[1,1024], index: 1, kind: input, shape index: {}]   ;;  %s432_s2 = inlined_call_operand.hbm [shape: f32[1,1024], index: 2, kind: output, shape index: {}]  }
   0x1   :  { %9 = vsyncpa [#allocation6], 0  ;;  %s330_s9 = smov [#allocation4]  }
   0x2   :  { %s16_s10 = sshll.u32 %s330_s9, 4  ;;  %s17_s10 = int_to_ptr.vmem [resolvable:$true] %s16_s10 }
   0x3   :  { %s294_s11 = scalar_lea.vmem %s17_s10, 128  ;;  %p299_p1 = scmp.lt.s32.totalorder %s17_s10, %s17_s10 }
   0x4   :  { %p295_p0 = scmp.ne.s32.totalorder %s17_s10, %s294_s11  ;;  %p300_p2 = scmp.lt.s32.totalorder %s294_s11, %s294_s11 }
   0x6   :  { %p301_p3 = por %p300_p2, %p299_p1 }
   0x8   :  { %p302_p4 = pnand %p301_p3, %p295_p0 }
   0xa   :  { %305 = shalt.err (!%p302_p4)
}
   0xb   :  { %19 = dma.hbm_to_vmem [thread:$0]  %s431_s1, 128, %s17_s10, [#allocation5]  }
   0xc   :  { %326 = dma.done.wait [#allocation5], 128  }
   0xd   :  { %327 = vsyncadd [#allocation5], 4294967168  ;;  %v24_v0 = vld [vmem:[#allocation4] sm:$0xff]  ;;  %v331_v14 = vmov 683565275  }
   0xe   :  { %v356_v1 = vmul.f32 1.5707964, %v24_v0  ;;  %v332_v16 = vmov 2475754826   ;;  %v333_v18 = vmov 2131351028  }
   0xf   :  { %v334_v20 = vmov 2102212464   ;;  %v335_v22 = vmov 920167782   ;;  %v336_v29 = vmov 1326507024  }
  0x10   :  { %v359_v2 = vmul.f32 4.0, %v356_v1 }
  0x12   :  { %v30_v3 = vand.u32 2139095040, %v359_v2  ;;  %v27_v5 = vand.u32 2147483647, %v359_v2  ;;  %vm29_vm7 = vcmp.lt.s32.totalorder %v359_v2, 0  ;;  %vm119_vm12 = vweird.f32 %v359_v2 }
  0x14   :  { %v31_v4 = vshrl.u32 %v30_v3, 23  ;;  %v34_v8 = vand.u32 8388607, %v27_v5  ;;  %vm28_vm8 = vcmp.le.f32.partialorder %v27_v5, 0.7853982 }
  0x16   :  { %v254_v6 = vadd.s32 4294967169, %v31_v4  ;;  %v35_v11 = vor.u32 8388608, %v34_v8 }
  0x18   :  { %v37_v7 = vadd.s32 1, %v254_v6  ;;  %v75_v31 = vshll.u32 %v35_v11, 8 }
  0x1a   :  { %vm38_vm0 = vcmp.gt.s32.totalorder %v37_v7, 0 }
  0x1b   :  { %v39_v9 = vsel %vm38_vm0, %v37_v7, 0 }
  0x1c   :  { %v41_v10 = vand.u32 31, %v39_v9  ;;  %v40_v12 = vshrl.u32 %v39_v9, 5 }
  0x1e   :  { %v42_v13 = vsub.s32 32, %v41_v10  ;;  %v44_v15 = vshll.u32 %v331_v14, %v41_v10  ;;  %v47_v17 = vshll.u32 %v332_v16, %v41_v10  ;;  %v50_v19 = vshll.u32 %v333_v18, %v41_v10 }
  0x1f   :  { %v53_v21 = vshll.u32 %v334_v20, %v41_v10  ;;  %v56_v23 = vshll.u32 %v335_v22, %v41_v10  ;;  %vm59_vm1 = vcmp.lt.s32.totalorder %v40_v12, 1  ;;  %vm62_vm2 = vcmp.lt.s32.totalorder %v40_v12, 4 }
  0x20   :  { %v43_v24 = vshrl.u32 %v331_v14, %v42_v13  ;;  %v45_v25 = vshrl.u32 %v332_v16, %v42_v13  ;;  %v48_v26 = vshrl.u32 %v333_v18, %v42_v13  ;;  %v51_v27 = vshrl.u32 %v334_v20, %v42_v13 }
  0x21   :  { %v54_v28 = vshrl.u32 %v335_v22, %v42_v13  ;;  %v57_v30 = vshrl.u32 %v336_v29, %v42_v13  ;;  %vm60_vm3 = vcmp.lt.s32.totalorder %v40_v12, 2  ;;  %vm61_vm4 = vcmp.lt.s32.totalorder %v40_v12, 3 }
  0x22   :  { %v46_v32 = vor.u32 %v45_v25, %v44_v15  ;;  %v49_v33 = vor.u32 %v48_v26, %v47_v17  ;;  %v52_v34 = vor.u32 %v51_v27, %v50_v19 }
  0x23   :  { %v55_v35 = vor.u32 %v54_v28, %v53_v21  ;;  %v58_v36 = vor.u32 %v57_v30, %v56_v23 }
  0x24   :  { %v63_v37 = vsel %vm59_vm1, %v43_v24, %v46_v32  ;;  %v64_v38 = vsel %vm62_vm2, %v52_v34, 2102212464  ;;  %v67_v39 = vsel %vm59_vm1, %v46_v32, %v49_v33  ;;  %v71_v40 = vsel %vm59_vm1, %v49_v33, %v52_v34 }
  0x25   :  { %v65_v41 = vsel %vm61_vm4, %v49_v33, %v64_v38  ;;  %v68_v42 = vsel %vm62_vm2, %v55_v35, 920167782  ;;  %v72_v43 = vsel %vm62_vm2, %v58_v36, 1326507024  ;;  %v131_v36 = vstv %s430_s0  ;;  %s337_s0 = smov [#allocation7]  }
  0x26   :  { %v69_v44 = vsel %vm61_vm4, %v52_v34, %v68_v42  ;;  %v73_v45 = vsel %vm61_vm4, %v55_v35, %v72_v43  ;;  %v66_v46 = vsel %vm60_vm3, %v63_v37, %v65_v41  ;;  %s245_s15 = sshll.u32 %s337_s0, 4  ;;  %s246_s15 = int_to_ptr.vmem [resolvable:$true] %s245_s15 }
  0x27   :  { %v70_v47 = vsel %vm60_vm3, %v67_v39, %v69_v44  ;;  %v74_v48 = vsel %vm60_vm3, %v71_v40, %v73_v45  ;;  %v82_v53 = vmul.u32 %v75_v31, %v66_v46  ;;  %s306_s16 = scalar_lea.vmem %s246_s15, 128  ;;  %p311_p6 = scmp.lt.s32.totalorder %s246_s15, %s246_s15 }
  0x28   :  { %v376_v49 = vmul.u32.u64.low %v75_v31, %v74_v48  ;;  %v377_v50 = vmul.u32.u64.high %v75_v31, %v74_v48, %v376_v49  ;;  %v379_v51 = vmul.u32.u64.low %v75_v31, %v70_v47  ;;  %v380_v52 = vmul.u32.u64.high %v75_v31, %v70_v47, %v379_v51  ;;  %p307_p5 = scmp.ne.s32.totalorder %s246_s15, %s306_s16  ;;  %p312_p7 = scmp.lt.s32.totalorder %s306_s16, %s306_s16 }
  0x2a   :  { %vm84_vm5 = vc.u32 %v377_v50, %v379_v51  ;;  %v85_v54 = vadd.s32 1, %v380_v52  ;;  %v83_v3 = vadd.s32 %v379_v51, %v377_v50  ;;  %p313_p8 = por %p312_p7, %p311_p6 }
  0x2c   :  { %v86_v55 = vsel %vm84_vm5, %v85_v54, %v380_v52  ;;  %p314_p9 = pnand %p313_p8, %p307_p5 }
  0x2d   :  { %v87_v56 = vadd.s32 %v86_v55, %v82_v53 }
  0x2f   :  { %v88_v57 = vadd.s32 536870912, %v87_v56 }
  0x31   :  { %v89_v58 = vshrl.u32 %v88_v57, 30 }
  0x33   :  { %v90_v59 = vshll.u32 %v89_v58, 30  ;;  %v113_v21 = vsub.s32 4, %v89_v58 }
  0x35   :  { %v91_v60 = vsub.s32 %v87_v56, %v90_v59  ;;  %v114_v25 = vsel %vm29_vm7, %v113_v21, %v89_v58 }
  0x36   :  { %v116_v27 = vsel %vm28_vm8, 0, %v114_v25 }
  0x37   :  { %v93_v61 = vsub.s32 0, %v91_v60  ;;  %v120_v28 = vadd.s32 3, %v116_v27 }
  0x39   :  { %v255_v62 = vmin.u32 %v93_v61, %v91_v60  ;;  %v121_v30 = vand.u32 3, %v120_v28 }
  0x3b   :  { %v95_v63 = vclz %v255_v62  ;;  %vm126_vm9 = vcmp.eq.s32.totalorder %v121_v30, 2  ;;  %vm123_vm10 = vcmp.eq.s32.totalorder %v121_v30, 0  ;;  %vm122_vm11 = vcmp.lt.s32.totalorder %v121_v30, 2 }
  0x3d   :  { %v256_v0 = vadd.s32 4294967294, %v95_v63 }
  0x3f   :  { %vm257_vm6 = vcmp.lt.s32.totalorder %v256_v0, 0 }
  0x40   :  { %v98_v4 = vsel %vm257_vm6, 0, %v256_v0 }
  0x41   :  { %v99_v6 = vsub.s32 32, %v98_v4  ;;  %v100_v7 = vshll.u32 %v91_v60, %v98_v4  ;;  %v103_v8 = vsub.s32 4294967266, %v98_v4 }
  0x43   :  { %v101_v9 = vshrl.u32 %v83_v3, %v99_v6  ;;  %v104_v10 = vadd.s32 127, %v103_v8 }
  0x45   :  { %v102_v11 = vor.u32 %v101_v9, %v100_v7  ;;  %v105_v12 = vshll.u32 %v104_v10, 23 }
  0x47   :  { %v106_v13 = vor.u32 4788187, %v105_v12  ;;  %v109_v15 = vcvt.s32.f32 %v102_v11 }
  0x49   :  { %v107_v17 = vand.u32 2147483647, %v106_v13 }
  0x4b   :  { %v110_v19 = vmul.f32 %v109_v15, %v107_v17 }
  0x4d   :  { %v111_v23 = vxor.u32 2147483648, %v110_v19 }
  0x4f   :  { %v112_v24 = vsel %vm29_vm7, %v111_v23, %v110_v19 }
  0x50   :  { %v115_v26 = vsel %vm28_vm8, %v359_v2, %v112_v24 }
  0x51   :  { %278 = vcosq.f32 %v115_v26 }
  0x52   :  { %280 = vsinq.f32 %v115_v26 }
  0x5e   :  { %v279_v31 = vpop.eup %278 }
  0x5f   :  { %v281_v32 = vpop.eup %280  ;;  %v127_v33 = vxor.u32 2147483648, %v279_v31 }
  0x60   :  { %v124_v34 = vxor.u32 2147483648, %v281_v32 }
  0x61   :  { %v128_v5 = vsel %vm126_vm9, %v127_v33, %v281_v32 }
  0x62   :  { %v125_v35 = vsel %vm123_vm10, %v279_v31, %v124_v34 }
  0x63   :  { %v129_v37 = vsel %vm122_vm11, %v125_v35, %v128_v5 }
  0x64   :  { %v130_v38 = vsel %vm119_vm12, nan, %v129_v37 }
  0x65   :  { %v132_v39 = vmul.f32 %v131_v36, %v130_v38 }
  0x67   :  { %v395_v40 = vadd.f32 %v132_v39, %v356_v1 }
  0x69   :  { %v137_v41 = vand.u32 2139095040, %v395_v40  ;;  %v134_v43 = vand.u32 2147483647, %v395_v40  ;;  %vm136_vm4 = vcmp.lt.s32.totalorder %v395_v40, 0  ;;  %vm226_vm9 = vweird.f32 %v395_v40 }
  0x6b   :  { %v138_v42 = vshrl.u32 %v137_v41, 23  ;;  %v141_v2 = vand.u32 8388607, %v134_v43  ;;  %vm135_vm5 = vcmp.le.f32.partialorder %v134_v43, 0.7853982 }
  0x6d   :  { %v258_v44 = vadd.s32 4294967169, %v138_v42  ;;  %v142_v48 = vor.u32 8388608, %v141_v2 }
  0x6f   :  { %v144_v45 = vadd.s32 1, %v258_v44  ;;  %v182_v61 = vshll.u32 %v142_v48, 8 }
  0x71   :  { %vm145_vm13 = vcmp.gt.s32.totalorder %v144_v45, 0 }
  0x72   :  { %v146_v46 = vsel %vm145_vm13, %v144_v45, 0 }
  0x73   :  { %v148_v47 = vand.u32 31, %v146_v46  ;;  %v147_v49 = vshrl.u32 %v146_v46, 5 }
  0x75   :  { %v149_v50 = vsub.s32 32, %v148_v47  ;;  %v151_v51 = vshll.u32 %v331_v14, %v148_v47  ;;  %v154_v1 = vshll.u32 %v332_v16, %v148_v47  ;;  %v157_v52 = vshll.u32 %v333_v18, %v148_v47 }
  0x76   :  { %v160_v53 = vshll.u32 %v334_v20, %v148_v47  ;;  %v163_v54 = vshll.u32 %v335_v22, %v148_v47  ;;  %vm166_vm14 = vcmp.lt.s32.totalorder %v147_v49, 1  ;;  %vm169_vm15 = vcmp.lt.s32.totalorder %v147_v49, 4 }
  0x77   :  { %v150_v55 = vshrl.u32 %v331_v14, %v149_v50  ;;  %v152_v56 = vshrl.u32 %v332_v16, %v149_v50  ;;  %v155_v57 = vshrl.u32 %v333_v18, %v149_v50  ;;  %v158_v58 = vshrl.u32 %v334_v20, %v149_v50 }
  0x78   :  { %v161_v59 = vshrl.u32 %v335_v22, %v149_v50  ;;  %v164_v60 = vshrl.u32 %v336_v29, %v149_v50  ;;  %vm167_vm0 = vcmp.lt.s32.totalorder %v147_v49, 2  ;;  %vm168_vm1 = vcmp.lt.s32.totalorder %v147_v49, 3 }
  0x79   :  { %v153_v62 = vor.u32 %v152_v56, %v151_v51  ;;  %v156_v63 = vor.u32 %v155_v57, %v154_v1  ;;  %v159_v0 = vor.u32 %v158_v58, %v157_v52 }
  0x7a   :  { %v162_v3 = vor.u32 %v161_v59, %v160_v53  ;;  %v165_v4 = vor.u32 %v164_v60, %v163_v54 }
  0x7b   :  { %v170_v14 = vsel %vm166_vm14, %v150_v55, %v153_v62  ;;  %v171_v16 = vsel %vm169_vm15, %v159_v0, 2102212464  ;;  %v174_v6 = vsel %vm166_vm14, %v153_v62, %v156_v63  ;;  %v178_v18 = vsel %vm166_vm14, %v156_v63, %v159_v0 }
  0x7c   :  { %v172_v7 = vsel %vm168_vm1, %v156_v63, %v171_v16  ;;  %v175_v20 = vsel %vm169_vm15, %v162_v3, 920167782  ;;  %v179_v8 = vsel %vm169_vm15, %v165_v4, 1326507024 }
  0x7d   :  { %v176_v22 = vsel %vm168_vm1, %v159_v0, %v175_v20  ;;  %v180_v9 = vsel %vm168_vm1, %v162_v3, %v179_v8  ;;  %v173_v29 = vsel %vm167_vm0, %v170_v14, %v172_v7 }
  0x7e   :  { %v177_v10 = vsel %vm167_vm0, %v174_v6, %v176_v22  ;;  %v181_v11 = vsel %vm167_vm0, %v178_v18, %v180_v9  ;;  %v189_v19 = vmul.u32 %v182_v61, %v173_v29 }
  0x7f   :  { %v412_v12 = vmul.u32.u64.low %v182_v61, %v181_v11  ;;  %v413_v13 = vmul.u32.u64.high %v182_v61, %v181_v11, %v412_v12  ;;  %v415_v15 = vmul.u32.u64.low %v182_v61, %v177_v10  ;;  %v416_v17 = vmul.u32.u64.high %v182_v61, %v177_v10, %v415_v15 }
  0x81   :  { %vm191_vm2 = vc.u32 %v413_v13, %v415_v15  ;;  %v192_v21 = vadd.s32 1, %v416_v17  ;;  %v190_v34 = vadd.s32 %v415_v15, %v413_v13 }
  0x83   :  { %v193_v23 = vsel %vm191_vm2, %v192_v21, %v416_v17 }
  0x84   :  { %v194_v24 = vadd.s32 %v193_v23, %v189_v19 }
  0x86   :  { %v195_v25 = vadd.s32 536870912, %v194_v24 }
  0x88   :  { %v196_v26 = vshrl.u32 %v195_v25, 30 }
  0x8a   :  { %v197_v27 = vshll.u32 %v196_v26, 30  ;;  %v220_v47 = vsub.s32 4, %v196_v26 }
  0x8c   :  { %v198_v28 = vsub.s32 %v194_v24, %v197_v27  ;;  %v221_v50 = vsel %vm136_vm4, %v220_v47, %v196_v26 }
  0x8d   :  { %v223_v1 = vsel %vm135_vm5, 0, %v221_v50 }
  0x8e   :  { %v200_v30 = vsub.s32 0, %v198_v28  ;;  %v227_v52 = vadd.s32 3, %v223_v1 }
  0x90   :  { %v259_v31 = vmin.u32 %v200_v30, %v198_v28  ;;  %v228_v53 = vand.u32 3, %v227_v52 }
  0x92   :  { %v202_v32 = vclz %v259_v31  ;;  %vm233_vm6 = vcmp.eq.s32.totalorder %v228_v53, 2  ;;  %vm230_vm7 = vcmp.eq.s32.totalorder %v228_v53, 0  ;;  %vm229_vm8 = vcmp.lt.s32.totalorder %v228_v53, 2 }
  0x94   :  { %v260_v33 = vadd.s32 4294967294, %v202_v32 }
  0x96   :  { %vm261_vm3 = vcmp.lt.s32.totalorder %v260_v33, 0 }
  0x97   :  { %v205_v5 = vsel %vm261_vm3, 0, %v260_v33 }
  0x98   :  { %v206_v35 = vsub.s32 32, %v205_v5  ;;  %v207_v36 = vshll.u32 %v198_v28, %v205_v5  ;;  %v210_v37 = vsub.s32 4294967266, %v205_v5 }
  0x9a   :  { %v208_v38 = vshrl.u32 %v190_v34, %v206_v35  ;;  %v211_v39 = vadd.s32 127, %v210_v37 }
  0x9c   :  { %v209_v41 = vor.u32 %v208_v38, %v207_v36  ;;  %v212_v42 = vshll.u32 %v211_v39, 23 }
  0x9e   :  { %v213_v44 = vor.u32 4788187, %v212_v42  ;;  %v216_v45 = vcvt.s32.f32 %v209_v41 }
  0xa0   :  { %v214_v2 = vand.u32 2147483647, %v213_v44 }
  0xa2   :  { %v217_v46 = vmul.f32 %v216_v45, %v214_v2 }
  0xa4   :  { %v218_v48 = vxor.u32 2147483648, %v217_v46 }
  0xa6   :  { %v219_v49 = vsel %vm136_vm4, %v218_v48, %v217_v46 }
  0xa7   :  { %v222_v51 = vsel %vm135_vm5, %v395_v40, %v219_v49 }
  0xa8   :  { %282 = vcosq.f32 %v222_v51 }
  0xa9   :  { %284 = vsinq.f32 %v222_v51 }
  0xb5   :  { %v283_v54 = vpop.eup %282 }
  0xb6   :  { %v285_v55 = vpop.eup %284  ;;  %v234_v56 = vxor.u32 2147483648, %v283_v54 }
  0xb7   :  { %v231_v57 = vxor.u32 2147483648, %v285_v55 }
  0xb8   :  { %v235_v43 = vsel %vm233_vm6, %v234_v56, %v285_v55 }
  0xb9   :  { %v232_v58 = vsel %vm230_vm7, %v283_v54, %v231_v57 }
  0xba   :  { %v236_v59 = vsel %vm229_vm8, %v232_v58, %v235_v43 }
  0xbb   :  { %v237_v60 = vsel %vm226_vm9, nan, %v236_v59 }
  0xbc   :  { %238 = vst [vmem:[#allocation7] sm:$0xff] %v237_v60 }
  0xbd   :  { %317 = shalt.err (!%p314_p9)
}
  0xbe   :  { %248 = dma.vmem_to_hbm [thread:$0]  %s246_s15, 128, %s432_s2, [#allocation6]  }
  0xbf   :  { %328 = dma.done.wait [#allocation6], 128  }
  0xc0   :  { %329 = vsyncadd [#allocation6], 4294967168 }
  0xc1   :  { %252 = vsyncpa [#allocation5], 1 }
  0xc2   :  { %253 = vsyncpa [#allocation6], 1 }

</bundles_post_ra>
